<compile_context>
chip_gen: v6e
topology: v6e:2x2x1
jax: 0.10.0
libtpu: 0.0.40
codegen_flags: <defaults>
</compile_context>

<pallas_src>
import functools
import math

import jax
import jax.numpy as jnp
from jax import lax
from jax.experimental import pallas as pl
from jax.experimental.pallas import tpu as pltpu


# ----------------------------------------------------------------------------
# Pallas kernel: fused Conv(im2col GEMM) + BN(eval, folded) + Hardtanh + mask.
# ----------------------------------------------------------------------------
def _fused_layer_kernel(lens_ref, p_ref, w_ref, shift_ref, o_ref,
                        *, tm, batch, wo, howo, mp):
    # (Cout, K) @ (K, tm) on the MXU; column m = b*Ho*Wo + ho*Wo + t is on lanes.
    y = jnp.dot(w_ref[...], p_ref[...], preferred_element_type=jnp.float32)
    # BN scale is folded into w; epilogue is shift + Hardtanh(0, 20).
    y = y + shift_ref[...]
    y = jnp.clip(y, 0.0, 20.0)

    # MaskConv: zero every column whose time index >= lengths[batch of column].
    col = pl.program_id(0) * tm + lax.broadcasted_iota(jnp.int32, (1, tm), 1)

    # lengths[b] per column via unrolled range compares (batch is small &
    # static); padded tail columns (col >= batch*howo) keep limit == 0.
    limit = jnp.zeros((1, tm), jnp.int32)
    for bb in range(batch):
        in_b = jnp.logical_and(col >= bb * howo, col < (bb + 1) * howo)
        limit = jnp.where(in_b, lens_ref[bb], limit)

    # t_idx = col % wo using only compare/select/sub (no vector integer div).
    t_idx = col
    s = wo
    while s * 2 < mp:
        s *= 2
    while s >= wo:
        t_idx = jnp.where(t_idx >= s, t_idx - s, t_idx)
        s //= 2

    o_ref[...] = jnp.where(t_idx < limit, y, 0.0).astype(o_ref.dtype)


# ----------------------------------------------------------------------------
# Wrapper helpers.
# ----------------------------------------------------------------------------
def _round_up(x, m):
    return (x + m - 1) // m * m


def _pick_tile(m, target=1024):
    # Lane tile for the GEMM's M axis: as large as practical (amortizes the
    # ~0.35us per-grid-step cost) but capped so the grid stays deep enough to
    # feed both TensorCores on v7x; (K<=200, 1024) bf16 double-buffered is
    # well under VMEM on v5e/v6e/v7x.
    return min(target, _round_up(m, 128))


def _im2col_t(x, kh, kw, sh, sw, ph, pw, dtype):
    """Transposed im2col: (C, B, H, W) -> (K, M), K = C*kh*kw (channel-major),
    M = B*Ho*Wo (batch-major, then feature row, then time)."""
    C, B, H, W = x.shape
    xp = jnp.pad(x, ((0, 0), (0, 0), (ph, ph), (pw, pw)))
    Ho = (H + 2 * ph - kh) // sh + 1
    Wo = (W + 2 * pw - kw) // sw + 1
    taps = []
    for i in range(kh):
        for j in range(kw):
            taps.append(xp[:, :, i:i + sh * Ho:sh, j:j + sw * Wo:sw])  # (C,B,Ho,Wo)
    p = jnp.stack(taps, axis=1)                           # (C, kh*kw, B, Ho, Wo)
    return p.reshape(C * kh * kw, B * Ho * Wo).astype(dtype), Ho, Wo


def _fold_bn(p):
    """Fold conv bias + eval-mode BatchNorm into per-channel (scaled w, shift)."""
    w, b = p["w"], p["b"]
    inv_std = 1.0 / jnp.sqrt(p["rvar"] + p["eps"])
    scale = p["gamma"] * inv_std                          # (Cout,)
    shift = p["beta"] + (b - p["rmean"]) * scale          # (Cout,)
    w_fold = w * scale[:, None, None, None]               # (Cout, Cin, Kh, Kw)
    return w_fold, shift


def masked_conv_layer(x_cbhw, lengths, p, *, compute_dtype=jnp.bfloat16,
                      tile_target=1024):
    """One fused (Conv2d -> BN(eval) -> Hardtanh(0,20)) + length mask.

    x_cbhw is (C, B, H, W) (W = time); returns (Cout, B, Ho, Wo) so layers
    chain without transposes.
    """
    Cout, Cin, Kh, Kw = p["w"].shape
    C, B, H, W = x_cbhw.shape
    assert C == Cin, (C, Cin)
    sh, sw = p["stride"]
    ph, pw = p["padding"]

    patches, Ho, Wo = _im2col_t(x_cbhw, Kh, Kw, sh, sw, ph, pw, compute_dtype)
    K, M = patches.shape

    w_fold, shift = _fold_bn(p)
    w2 = w_fold.reshape(Cout, Cin * Kh * Kw).astype(compute_dtype)  # (Cout, K)
    shift = shift.reshape(Cout, 1).astype(jnp.float32)

    tm = _pick_tile(M, tile_target)
    Mp = pl.cdiv(M, tm) * tm
    if Mp != M:
        patches = jnp.pad(patches, ((0, 0), (0, Mp - M)))

    kernel = functools.partial(_fused_layer_kernel, tm=tm, batch=B, wo=Wo,
                               howo=Ho * Wo, mp=Mp)

    out = pl.pallas_call(
        kernel,
        out_shape=jax.ShapeDtypeStruct((Cout, Mp), jnp.float32),
        grid_spec=pltpu.PrefetchScalarGridSpec(
            num_scalar_prefetch=1,                        # lengths -> SMEM
            grid=(Mp // tm,),
            in_specs=[
                pl.BlockSpec((K, tm), lambda i, lens: (0, i)),    # im2col patches
                pl.BlockSpec((Cout, K), lambda i, lens: (0, 0)),  # folded weight
                pl.BlockSpec((Cout, 1), lambda i, lens: (0, 0)),  # bias/BN shift
            ],
            out_specs=pl.BlockSpec((Cout, tm), lambda i, lens: (0, i)),
        ),
        compiler_params=pltpu.CompilerParams(
            dimension_semantics=("parallel",)),
    )(lengths.astype(jnp.int32), patches, w2, shift)

    return out[:, :M].reshape(Cout, B, Ho, Wo)


def mask_conv_forward(x, lengths, layer_params, *, compute_dtype=jnp.bfloat16):
    """Equivalent of MaskConv.forward: x is NCHW (B,C,D,T) -> (masked_out, lengths)."""
    y = jnp.transpose(x, (1, 0, 2, 3))                # (C,B,D,T): kernel-native layout
    for p in layer_params:
        y = masked_conv_layer(y, lengths, p, compute_dtype=compute_dtype)
    return jnp.transpose(y, (1, 0, 2, 3)), lengths    # back to NCHW for the caller


# ----------------------------------------------------------------------------
# Pure-JAX references.
# ----------------------------------------------------------------------------
def reference_forward_exact(x, lengths, layer_params):
    """f32 mirror of the PyTorch per-module loop (conv->mask->BN->mask->htanh->mask)."""
    for p in layer_params:
        y = lax.conv_general_dilated(
            x, p["w"], window_strides=p["stride"],
            padding=[(p["padding"][0],) * 2, (p["padding"][1],) * 2],
            dimension_numbers=("NCHW", "OIHW", "NCHW"))
        y = y + p["b"].reshape(1, -1, 1, 1)
        T = y.shape[3]
        m = (jnp.arange(T)[None, :] < lengths[:, None]).astype(y.dtype)[:, None, None, :]
        y = y * m
        inv_std = 1.0 / jnp.sqrt(p["rvar"] + p["eps"])
        y = ((y - p["rmean"].reshape(1, -1, 1, 1))
             * (p["gamma"] * inv_std).reshape(1, -1, 1, 1)
             + p["beta"].reshape(1, -1, 1, 1))
        y = y * m
        y = jnp.clip(y, 0.0, 20.0)
        y = y * m
        x = y
    return x, lengths


def reference_forward_mirror(x, lengths, layer_params, compute_dtype=jnp.bfloat16):
    """Reference matching the kernel numerics (bf16 operands, f32 accumulation,
    BN folded) -- used for the tight correctness check."""
    for p in layer_params:
        w_fold, shift = _fold_bn(p)
        y = lax.conv_general_dilated(
            x.astype(compute_dtype), w_fold.astype(compute_dtype),
            window_strides=p["stride"],
            padding=[(p["padding"][0],) * 2, (p["padding"][1],) * 2],
            dimension_numbers=("NCHW", "OIHW", "NCHW"),
            preferred_element_type=jnp.float32)
        y = y + shift.reshape(1, -1, 1, 1)
        y = jnp.clip(y, 0.0, 20.0)
        T = y.shape[3]
        m = (jnp.arange(T)[None, :] < lengths[:, None]).astype(y.dtype)[:, None, None, :]
        x = y * m
    return x, lengths


def make_layer(key, cin, cout, ksize, stride, padding):
    kw, kb, kg, kbeta, km, kv = jax.random.split(key, 6)
    fan_in = cin * ksize[0] * ksize[1]
    bound = 1.0 / math.sqrt(fan_in)
    return dict(
        w=jax.random.uniform(kw, (cout, cin) + ksize, jnp.float32, -bound, bound),
        b=jax.random.uniform(kb, (cout,), jnp.float32, -bound, bound),
        gamma=1.0 + 0.1 * jax.random.normal(kg, (cout,), jnp.float32),
        beta=0.1 * jax.random.normal(kbeta, (cout,), jnp.float32),
        rmean=0.1 * jax.random.normal(km, (cout,), jnp.float32),
        rvar=1.0 + 0.25 * jax.random.uniform(kv, (cout,), jnp.float32),
        eps=1e-5, stride=stride, padding=padding)


if __name__ == "__main__":
    key = jax.random.PRNGKey(0)
    kx, kl1, kl2 = jax.random.split(key, 3)

    # x: BxCxDxT  (batch=2, in-channels=1, feature=16, time=16)
    B, Cin, D, T = 2, 1, 16, 16
    x = jax.random.normal(kx, (B, Cin, D, T), dtype=jnp.float32)
    lengths = jnp.array([8, 5], dtype=jnp.int32)   # used as-is per layer (like the module)

    layer_params = [
        make_layer(kl1, 1, 8, (5, 5), (2, 2), (2, 2)),
        make_layer(kl2, 8, 8, (5, 5), (2, 1), (2, 2)),
    ]

    fwd = jax.jit(lambda xx, ll: mask_conv_forward(xx, ll, layer_params))
    out, out_lengths = fwd(x, lengths)
    out = jax.block_until_ready(out)

    ref_mirror, _ = reference_forward_mirror(x, lengths, layer_params)
    ref_exact, _ = reference_forward_exact(x, lengths, layer_params)

    assert out.shape == ref_exact.shape, (out.shape, ref_exact.shape)
    err_m = float(jnp.max(jnp.abs(out - ref_mirror)))
    assert jnp.allclose(out, ref_mirror, rtol=2e-2, atol=2e-2), \
        f"mirror (bf16/f32-acc) max abs err {err_m}"
    err_e = float(jnp.max(jnp.abs(out - ref_exact)))
    assert jnp.allclose(out, ref_exact, rtol=1e-1, atol=2.5e-1), \
        f"exact f32 max abs err {err_e}"

    print("KERNEL_OK")
</pallas_src>

<mosaic_0001>
module attributes {stable_mosaic.version = 11 : i64} {
  func.func @_fused_layer_kernel(%arg0: i32, %arg1: memref<2xi32, #tpu.memory_space<smem>>, %arg2: memref<25x128xbf16, #tpu.memory_space<vmem>>, %arg3: memref<8x25xbf16, #tpu.memory_space<vmem>>, %arg4: memref<8x1xf32, #tpu.memory_space<vmem>>, %arg5: memref<8x128xf32, #tpu.memory_space<vmem>>) attributes {dimension_semantics = [#tpu.dimension_semantics<parallel>], iteration_bounds = array<i64: 1>, scalar_prefetch = 1 : i64, scratch_operands = 0 : i64, tpu.core_type = #tpu.core_type<tc>, window_params = [{transform_indices = @transform_0, window_bounds = array<i64: 25, 128>}, {pipeline_mode = #tpu.pipeline_mode<synchronous>, transform_indices = @transform_1, window_bounds = array<i64: 8, 25>}, {pipeline_mode = #tpu.pipeline_mode<synchronous>, transform_indices = @transform_2, window_bounds = array<i64: 8, 1>}, {transform_indices = @transform_3, window_bounds = array<i64: 8, 128>}]} {
    %c0 = arith.constant 0 : index
    %c0_0 = arith.constant 0 : index
    %0 = vector.load %arg3[%c0, %c0_0] : memref<8x25xbf16, #tpu.memory_space<vmem>>, vector<8x25xbf16>
    %c0_1 = arith.constant 0 : index
    %c0_2 = arith.constant 0 : index
    %1 = vector.load %arg2[%c0_1, %c0_2] : memref<25x128xbf16, #tpu.memory_space<vmem>>, vector<25x128xbf16>
    %cst = arith.constant dense<0.000000e+00> : vector<8x128xf32>
    %2 = tpu.matmul %0, %1, %cst {dimension_numbers = #tpu.dot_dimension_numbers<[1], [0], [0], [1], [0, 0, 1, 1], [], []>} : vector<8x25xbf16>, vector<25x128xbf16>, vector<8x128xf32> -> vector<8x128xf32>
    %c0_3 = arith.constant 0 : index
    %c0_4 = arith.constant 0 : index
    %3 = vector.load %arg4[%c0_3, %c0_4] : memref<8x1xf32, #tpu.memory_space<vmem>>, vector<8x1xf32>
    %4 = vector.broadcast %3 : vector<8x1xf32> to vector<8x128xf32>
    %5 = arith.addf %2, %4 : vector<8x128xf32>
    %cst_5 = arith.constant 0.000000e+00 : f32
    %cst_6 = arith.constant 2.000000e+01 : f32
    %6 = vector.broadcast %cst_5 : f32 to vector<8x128xf32>
    %7 = arith.maximumf %6, %5 : vector<8x128xf32>
    %8 = vector.broadcast %cst_6 : f32 to vector<8x128xf32>
    %9 = arith.minimumf %8, %7 : vector<8x128xf32>
    %c128_i32 = arith.constant 128 : i32
    %10 = arith.muli %arg0, %c128_i32 : i32
    %11 = tpu.iota {dimensions = array<i32: 1>} : vector<1x128xi32>
    %12 = vector.broadcast %10 : i32 to vector<1x128xi32>
    %13 = arith.addi %12, %11 : vector<1x128xi32>
    %c0_i32 = arith.constant 0 : i32
    %14 = vector.broadcast %c0_i32 : i32 to vector<1x128xi32>
    %c0_i32_7 = arith.constant 0 : i32
    %15 = vector.broadcast %c0_i32_7 : i32 to vector<1x128xi32>
    %16 = arith.cmpi sge, %13, %15 : vector<1x128xi32>
    %c64_i32 = arith.constant 64 : i32
    %17 = vector.broadcast %c64_i32 : i32 to vector<1x128xi32>
    %18 = arith.cmpi slt, %13, %17 : vector<1x128xi32>
    %19 = arith.andi %16, %18 : vector<1x128xi1>
    %c0_8 = arith.constant 0 : index
    %20 = memref.load %arg1[%c0_8] : memref<2xi32, #tpu.memory_space<smem>>
    %21 = vector.broadcast %20 : i32 to vector<1x128xi32>
    %22 = arith.select %19, %21, %14 : vector<1x128xi1>, vector<1x128xi32>
    %c64_i32_9 = arith.constant 64 : i32
    %23 = vector.broadcast %c64_i32_9 : i32 to vector<1x128xi32>
    %24 = arith.cmpi sge, %13, %23 : vector<1x128xi32>
    %c128_i32_10 = arith.constant 128 : i32
    %25 = vector.broadcast %c128_i32_10 : i32 to vector<1x128xi32>
    %26 = arith.cmpi slt, %13, %25 : vector<1x128xi32>
    %27 = arith.andi %24, %26 : vector<1x128xi1>
    %c1 = arith.constant 1 : index
    %28 = memref.load %arg1[%c1] : memref<2xi32, #tpu.memory_space<smem>>
    %29 = vector.broadcast %28 : i32 to vector<1x128xi32>
    %30 = arith.select %27, %29, %22 : vector<1x128xi1>, vector<1x128xi32>
    %c64_i32_11 = arith.constant 64 : i32
    %31 = vector.broadcast %c64_i32_11 : i32 to vector<1x128xi32>
    %32 = arith.cmpi sge, %13, %31 : vector<1x128xi32>
    %c64_i32_12 = arith.constant 64 : i32
    %33 = vector.broadcast %c64_i32_12 : i32 to vector<1x128xi32>
    %34 = arith.subi %13, %33 : vector<1x128xi32>
    %35 = arith.select %32, %34, %13 : vector<1x128xi1>, vector<1x128xi32>
    %c32_i32 = arith.constant 32 : i32
    %36 = vector.broadcast %c32_i32 : i32 to vector<1x128xi32>
    %37 = arith.cmpi sge, %35, %36 : vector<1x128xi32>
    %c32_i32_13 = arith.constant 32 : i32
    %38 = vector.broadcast %c32_i32_13 : i32 to vector<1x128xi32>
    %39 = arith.subi %35, %38 : vector<1x128xi32>
    %40 = arith.select %37, %39, %35 : vector<1x128xi1>, vector<1x128xi32>
    %c16_i32 = arith.constant 16 : i32
    %41 = vector.broadcast %c16_i32 : i32 to vector<1x128xi32>
    %42 = arith.cmpi sge, %40, %41 : vector<1x128xi32>
    %c16_i32_14 = arith.constant 16 : i32
    %43 = vector.broadcast %c16_i32_14 : i32 to vector<1x128xi32>
    %44 = arith.subi %40, %43 : vector<1x128xi32>
    %45 = arith.select %42, %44, %40 : vector<1x128xi1>, vector<1x128xi32>
    %c8_i32 = arith.constant 8 : i32
    %46 = vector.broadcast %c8_i32 : i32 to vector<1x128xi32>
    %47 = arith.cmpi sge, %45, %46 : vector<1x128xi32>
    %c8_i32_15 = arith.constant 8 : i32
    %48 = vector.broadcast %c8_i32_15 : i32 to vector<1x128xi32>
    %49 = arith.subi %45, %48 : vector<1x128xi32>
    %50 = arith.select %47, %49, %45 : vector<1x128xi1>, vector<1x128xi32>
    %51 = arith.cmpi slt, %50, %30 : vector<1x128xi32>
    %cst_16 = arith.constant 0.000000e+00 : f32
    %52 = vector.shape_cast %51 : vector<1x128xi1> to vector<1x128xi1>
    %53 = vector.broadcast %52 : vector<1x128xi1> to vector<8x128xi1>
    %54 = vector.broadcast %cst_16 : f32 to vector<8x128xf32>
    %55 = arith.select %53, %9, %54 : vector<8x128xi1>, vector<8x128xf32>
    %c0_17 = arith.constant 0 : index
    %c0_18 = arith.constant 0 : index
    %56 = vector.load %arg5[%c0_17, %c0_18] : memref<8x128xf32, #tpu.memory_space<vmem>>, vector<8x128xf32>
    tpu.vector_store %arg5[%c0_17, %c0_18], %55 {strides = array<i32>} : memref<8x128xf32, #tpu.memory_space<vmem>>, vector<8x128xf32>,
    return
  }
  func.func @transform_0(%arg0: i32, %arg1: memref<2xi32, #tpu.memory_space<smem>>) -> (i32, i32) {
    %c0_i32 = arith.constant 0 : i32
    %c0_i32_0 = arith.constant 0 : i32
    return %c0_i32, %arg0 : i32, i32
  }
  func.func @transform_1(%arg0: i32, %arg1: memref<2xi32, #tpu.memory_space<smem>>) -> (i32, i32) {
    %c0_i32 = arith.constant 0 : i32
    %c0_i32_0 = arith.constant 0 : i32
    %c0_i32_1 = arith.constant 0 : i32
    return %c0_i32, %c0_i32_0 : i32, i32
  }
  func.func @transform_2(%arg0: i32, %arg1: memref<2xi32, #tpu.memory_space<smem>>) -> (i32, i32) {
    %c0_i32 = arith.constant 0 : i32
    %c0_i32_0 = arith.constant 0 : i32
    %c0_i32_1 = arith.constant 0 : i32
    return %c0_i32, %c0_i32_0 : i32, i32
  }
  func.func @transform_3(%arg0: i32, %arg1: memref<2xi32, #tpu.memory_space<smem>>) -> (i32, i32) {
    %c0_i32 = arith.constant 0 : i32
    %c0_i32_0 = arith.constant 0 : i32
    return %c0_i32, %arg0 : i32, i32
  }
}

module attributes {stable_mosaic.version = 11 : i64} {
  func.func @_fused_layer_kernel(%arg0: i32, %arg1: memref<2xi32, #tpu.memory_space<smem>>, %arg2: memref<200x128xbf16, #tpu.memory_space<vmem>>, %arg3: memref<8x200xbf16, #tpu.memory_space<vmem>>, %arg4: memref<8x1xf32, #tpu.memory_space<vmem>>, %arg5: memref<8x128xf32, #tpu.memory_space<vmem>>) attributes {dimension_semantics = [#tpu.dimension_semantics<parallel>], iteration_bounds = array<i64: 1>, scalar_prefetch = 1 : i64, scratch_operands = 0 : i64, tpu.core_type = #tpu.core_type<tc>, window_params = [{transform_indices = @transform_0, window_bounds = array<i64: 200, 128>}, {pipeline_mode = #tpu.pipeline_mode<synchronous>, transform_indices = @transform_1, window_bounds = array<i64: 8, 200>}, {pipeline_mode = #tpu.pipeline_mode<synchronous>, transform_indices = @transform_2, window_bounds = array<i64: 8, 1>}, {transform_indices = @transform_3, window_bounds = array<i64: 8, 128>}]} {
    %c0 = arith.constant 0 : index
    %c0_0 = arith.constant 0 : index
    %0 = vector.load %arg3[%c0, %c0_0] : memref<8x200xbf16, #tpu.memory_space<vmem>>, vector<8x200xbf16>
    %c0_1 = arith.constant 0 : index
    %c0_2 = arith.constant 0 : index
    %1 = vector.load %arg2[%c0_1, %c0_2] : memref<200x128xbf16, #tpu.memory_space<vmem>>, vector<200x128xbf16>
    %cst = arith.constant dense<0.000000e+00> : vector<8x128xf32>
    %2 = tpu.matmul %0, %1, %cst {dimension_numbers = #tpu.dot_dimension_numbers<[1], [0], [0], [1], [0, 0, 1, 1], [], []>} : vector<8x200xbf16>, vector<200x128xbf16>, vector<8x128xf32> -> vector<8x128xf32>
    %c0_3 = arith.constant 0 : index
    %c0_4 = arith.constant 0 : index
    %3 = vector.load %arg4[%c0_3, %c0_4] : memref<8x1xf32, #tpu.memory_space<vmem>>, vector<8x1xf32>
    %4 = vector.broadcast %3 : vector<8x1xf32> to vector<8x128xf32>
    %5 = arith.addf %2, %4 : vector<8x128xf32>
    %cst_5 = arith.constant 0.000000e+00 : f32
    %cst_6 = arith.constant 2.000000e+01 : f32
    %6 = vector.broadcast %cst_5 : f32 to vector<8x128xf32>
    %7 = arith.maximumf %6, %5 : vector<8x128xf32>
    %8 = vector.broadcast %cst_6 : f32 to vector<8x128xf32>
    %9 = arith.minimumf %8, %7 : vector<8x128xf32>
    %c128_i32 = arith.constant 128 : i32
    %10 = arith.muli %arg0, %c128_i32 : i32
    %11 = tpu.iota {dimensions = array<i32: 1>} : vector<1x128xi32>
    %12 = vector.broadcast %10 : i32 to vector<1x128xi32>
    %13 = arith.addi %12, %11 : vector<1x128xi32>
    %c0_i32 = arith.constant 0 : i32
    %14 = vector.broadcast %c0_i32 : i32 to vector<1x128xi32>
    %c0_i32_7 = arith.constant 0 : i32
    %15 = vector.broadcast %c0_i32_7 : i32 to vector<1x128xi32>
    %16 = arith.cmpi sge, %13, %15 : vector<1x128xi32>
    %c32_i32 = arith.constant 32 : i32
    %17 = vector.broadcast %c32_i32 : i32 to vector<1x128xi32>
    %18 = arith.cmpi slt, %13, %17 : vector<1x128xi32>
    %19 = arith.andi %16, %18 : vector<1x128xi1>
    %c0_8 = arith.constant 0 : index
    %20 = memref.load %arg1[%c0_8] : memref<2xi32, #tpu.memory_space<smem>>
    %21 = vector.broadcast %20 : i32 to vector<1x128xi32>
    %22 = arith.select %19, %21, %14 : vector<1x128xi1>, vector<1x128xi32>
    %c32_i32_9 = arith.constant 32 : i32
    %23 = vector.broadcast %c32_i32_9 : i32 to vector<1x128xi32>
    %24 = arith.cmpi sge, %13, %23 : vector<1x128xi32>
    %c64_i32 = arith.constant 64 : i32
    %25 = vector.broadcast %c64_i32 : i32 to vector<1x128xi32>
    %26 = arith.cmpi slt, %13, %25 : vector<1x128xi32>
    %27 = arith.andi %24, %26 : vector<1x128xi1>
    %c1 = arith.constant 1 : index
    %28 = memref.load %arg1[%c1] : memref<2xi32, #tpu.memory_space<smem>>
    %29 = vector.broadcast %28 : i32 to vector<1x128xi32>
    %30 = arith.select %27, %29, %22 : vector<1x128xi1>, vector<1x128xi32>
    %c64_i32_10 = arith.constant 64 : i32
    %31 = vector.broadcast %c64_i32_10 : i32 to vector<1x128xi32>
    %32 = arith.cmpi sge, %13, %31 : vector<1x128xi32>
    %c64_i32_11 = arith.constant 64 : i32
    %33 = vector.broadcast %c64_i32_11 : i32 to vector<1x128xi32>
    %34 = arith.subi %13, %33 : vector<1x128xi32>
    %35 = arith.select %32, %34, %13 : vector<1x128xi1>, vector<1x128xi32>
    %c32_i32_12 = arith.constant 32 : i32
    %36 = vector.broadcast %c32_i32_12 : i32 to vector<1x128xi32>
    %37 = arith.cmpi sge, %35, %36 : vector<1x128xi32>
    %c32_i32_13 = arith.constant 32 : i32
    %38 = vector.broadcast %c32_i32_13 : i32 to vector<1x128xi32>
    %39 = arith.subi %35, %38 : vector<1x128xi32>
    %40 = arith.select %37, %39, %35 : vector<1x128xi1>, vector<1x128xi32>
    %c16_i32 = arith.constant 16 : i32
    %41 = vector.broadcast %c16_i32 : i32 to vector<1x128xi32>
    %42 = arith.cmpi sge, %40, %41 : vector<1x128xi32>
    %c16_i32_14 = arith.constant 16 : i32
    %43 = vector.broadcast %c16_i32_14 : i32 to vector<1x128xi32>
    %44 = arith.subi %40, %43 : vector<1x128xi32>
    %45 = arith.select %42, %44, %40 : vector<1x128xi1>, vector<1x128xi32>
    %c8_i32 = arith.constant 8 : i32
    %46 = vector.broadcast %c8_i32 : i32 to vector<1x128xi32>
    %47 = arith.cmpi sge, %45, %46 : vector<1x128xi32>
    %c8_i32_15 = arith.constant 8 : i32
    %48 = vector.broadcast %c8_i32_15 : i32 to vector<1x128xi32>
    %49 = arith.subi %45, %48 : vector<1x128xi32>
    %50 = arith.select %47, %49, %45 : vector<1x128xi1>, vector<1x128xi32>
    %51 = arith.cmpi slt, %50, %30 : vector<1x128xi32>
    %cst_16 = arith.constant 0.000000e+00 : f32
    %52 = vector.shape_cast %51 : vector<1x128xi1> to vector<1x128xi1>
    %53 = vector.broadcast %52 : vector<1x128xi1> to vector<8x128xi1>
    %54 = vector.broadcast %cst_16 : f32 to vector<8x128xf32>
    %55 = arith.select %53, %9, %54 : vector<8x128xi1>, vector<8x128xf32>
    %c0_17 = arith.constant 0 : index
    %c0_18 = arith.constant 0 : index
    %56 = vector.load %arg5[%c0_17, %c0_18] : memref<8x128xf32, #tpu.memory_space<vmem>>, vector<8x128xf32>
    tpu.vector_store %arg5[%c0_17, %c0_18], %55 {strides = array<i32>} : memref<8x128xf32, #tpu.memory_space<vmem>>, vector<8x128xf32>,
    return
  }
  func.func @transform_0(%arg0: i32, %arg1: memref<2xi32, #tpu.memory_space<smem>>) -> (i32, i32) {
    %c0_i32 = arith.constant 0 : i32
    %c0_i32_0 = arith.constant 0 : i32
    return %c0_i32, %arg0 : i32, i32
  }
  func.func @transform_1(%arg0: i32, %arg1: memref<2xi32, #tpu.memory_space<smem>>) -> (i32, i32) {
    %c0_i32 = arith.constant 0 : i32
    %c0_i32_0 = arith.constant 0 : i32
    %c0_i32_1 = arith.constant 0 : i32
    return %c0_i32, %c0_i32_0 : i32, i32
  }
  func.func @transform_2(%arg0: i32, %arg1: memref<2xi32, #tpu.memory_space<smem>>) -> (i32, i32) {
    %c0_i32 = arith.constant 0 : i32
    %c0_i32_0 = arith.constant 0 : i32
    %c0_i32_1 = arith.constant 0 : i32
    return %c0_i32, %c0_i32_0 : i32, i32
  }
  func.func @transform_3(%arg0: i32, %arg1: memref<2xi32, #tpu.memory_space<smem>>) -> (i32, i32) {
    %c0_i32 = arith.constant 0 : i32
    %c0_i32_0 = arith.constant 0 : i32
    return %c0_i32, %arg0 : i32, i32
  }
}

</mosaic_0001>

<bundles_post_ra>
// kernel: _lambda_.2
= control target key start
LH: loop header
LB: loop body
LE: loop exit
PB: predicated region body
PF: predicated region fallthrough
CT: control target
= control target key end

     0   :  { %s225_s0 = inlined_call_operand.vmem [shape: s32[2], index: 0, kind: input, shape index: {}]   ;;  %s226_s1 = inlined_call_operand.vmem [shape: bf16[25,128], index: 1, kind: input, shape index: {}]   ;;  %s227_s2 = inlined_call_operand.vmem [shape: bf16[8,25], index: 2, kind: input, shape index: {}]   ;;  %s228_s3 = inlined_call_operand.vmem [shape: f32[8,1], index: 3, kind: input, shape index: {}]   ;;  %s229_s4 = inlined_call_operand.vmem [shape: f32[8,128], index: 4, kind: output, shape index: {}]  }
   0x1   :  { %s9_s17 = sshll.u32 %s225_s0, 4  ;;  %s10_s17 = int_to_ptr.vmem [resolvable:$true] %s9_s17 }
   0x2   :  { %s161_s18 = scalar_lea.vmem %s10_s17, 16  ;;  %p166_p1 = scmp.lt.s32.totalorder %s10_s17, %s10_s17 }
   0x3   :  { %p162_p0 = scmp.ne.s32.totalorder %s10_s17, %s161_s18  ;;  %p167_p2 = scmp.lt.s32.totalorder %s161_s18, %s161_s18 }
   0x5   :  { %p168_p3 = por %p167_p2, %p166_p1 }
   0x7   :  { %p169_p4 = pnand %p168_p3, %p162_p0 }
   0x9   :  { %172 = shalt.err (!%p169_p4)  }
   0xa   :  { %s175_s19 = smov [#allocation3]  }
   0xb   :  { %12 = dma.vmem_to_smem %s10_s17, 16, %s175_s19, [#allocation2] }
   0xc   :  { %173 = dma.done.wait [#allocation2], 16 }
   0xd   :  { %174 = vsyncadd [#allocation2], 4294967280 }
   0xe   :  { %14 = sfence }
   0xf   :  { %vm48_vm0 = vcmask 1043456   ;;  %v176_v0 = vmov 0.0   ;;  %v159_v1 = vld [vmem:[%s226_s1 + $0x8] sm:$0x1f]   ;;  %vm49_vm1 = vcmask 1044480   ;;  %v177_v2 = vmov 65535  }
  0x10   :  { %145 = vmatprep.subr.bf16.mxu0 %v176_v0  ;;  %v50_v3 = vsel %vm48_vm0, 4294967295, %v177_v2  ;;  %vm178_vm2 = vmmov 0   ;;  %v27_v5 = vld [vmem:[%s228_s3] sm:$0xff]  ;;  %v179_v7 = vmov 0   ;;  %vm44_vm3 = vcmask 203776   ;;  %s105_s3 = sld [smem:[#allocation3]] }
  0x11   :  { %v51_v4 = vsel %vm49_vm1, %v50_v3, 0  ;;  %149 = vmatprep.mubr.msk.bf16.mxu0 %vm178_vm2, %v176_v0  ;;  %158 = vset.pattern.permute.xlu0 %v179_v7  ;;  %v160_v8 = vld [vmem:[%s226_s1] sm:$0xff]   ;;  %v98_v10 = vlaneseq  ;;  %s137_s27 = sld [smem:[#allocation3 + $0x1]] }
  0x12   :  { %v53_v6 = vand.u32 %v159_v1, %v51_v4  ;;  %30 = vperm.xlu0 %158, %v27_v5   ;;  %v22_v9 = vld [vmem:[%s227_s2] sm:$0xf] }
  0x13   :  { %v99_v11 = vand.u32 127, %v98_v10 }
  0x14   :  { %146 = vmatpush3.bf16.msra.mxu0 %v53_v6 }
  0x15   :  { %147 = vmatprep.subr.bf16.mxu0 %v176_v0  ;;  %v138_v12 = vadd.s32 4294967232, %v99_v11  ;;  %vm108_vm4 = vcmp.ge.s32.totalorder %v99_v11, 64  ;;  %vm103_vm7 = vcmp.lt.s32.totalorder %v99_v11, 64 }
  0x16   :  { %v106_v18 = vstv %s105_s3 }
  0x17   :  { %v115_v13 = vsel %vm108_vm4, %v138_v12, %v99_v11  ;;  %v107_v21 = vsel %vm103_vm7, %v106_v18, 0  ;;  %v112_v22 = vstv %s137_s27 }
  0x18   :  { %148 = vmatpush3.bf16.msra.mxu0 %v160_v8  ;;  %v139_v14 = vadd.s32 4294967264, %v115_v13  ;;  %vm116_vm5 = vcmp.ge.s32.totalorder %v115_v13, 32  ;;  %v113_v25 = vsel %vm108_vm4, %v112_v22, %v107_v21 }
  0x1a   :  { %v118_v15 = vsel %vm116_vm5, %v139_v14, %v115_v13 }
  0x1b   :  { %150 = vmatmul.mubr.msk.bf16.vlgmr.msra.gmra.mxu0 %vm44_vm3, %v22_v9  ;;  %v140_v16 = vadd.s32 4294967280, %v118_v15  ;;  %vm119_vm6 = vcmp.ge.s32.totalorder %v118_v15, 16 }
  0x1d   :  { %v121_v17 = vsel %vm119_vm6, %v140_v16, %v118_v15 }
  0x1e   :  { %v141_v19 = vadd.s32 4294967288, %v121_v17  ;;  %vm122_vm8 = vcmp.ge.s32.totalorder %v121_v17, 8 }
  0x20   :  { %v124_v26 = vsel %vm122_vm8, %v141_v19, %v121_v17 }
  0x21   :  { %vm125_vm9 = vcmp.lt.s32.totalorder %v124_v26, %v113_v25 }
  0x8d   :  { %v31_v20 = vpop.permute.xlu0 %30 }
  0xdb   :  { %v89_v23 = vpop.f32.mrf.mxu0 }
  0xdc   :  { %v90_v24 = vadd.f32 %v89_v23, %v31_v20 }
  0xdd   :  { %v151_v27 = vpop.f32.mrf.mxu0 }
  0xde   :  { %v95_v28 = vmax.f32 %v90_v24, 0.0 }
  0xdf   :  { %v92_v29 = vpop.f32.mrf.mxu0 }
  0xe0   :  { %v96_v30 = vmin.f32 %v95_v28, 20.0 }
  0xe1   :  { %v152_v31 = vpop.f32.mrf.mxu0 }
  0xe2   :  { %v128_v32 = vsel %vm125_vm9, %v96_v30, 0.0 }
  0xe3   :  { %129 = vst [vmem:[%s229_s4] sm:$0xff] %v128_v32 }

// kernel: _lambda_.3
= control target key start
LH: loop header
LB: loop body
LE: loop exit
PB: predicated region body
PF: predicated region fallthrough
CT: control target
= control target key end

     0   :  { %s354_s0 = inlined_call_operand.vmem [shape: s32[2], index: 0, kind: input, shape index: {}]   ;;  %s355_s1 = inlined_call_operand.vmem [shape: bf16[200,128], index: 1, kind: input, shape index: {}]   ;;  %s356_s2 = inlined_call_operand.vmem [shape: bf16[8,200], index: 2, kind: input, shape index: {}]   ;;  %s357_s3 = inlined_call_operand.vmem [shape: f32[8,1], index: 3, kind: input, shape index: {}]   ;;  %s358_s4 = inlined_call_operand.vmem [shape: f32[8,128], index: 4, kind: output, shape index: {}]  }
   0x1   :  { %s9_s17 = sshll.u32 %s354_s0, 4  ;;  %s10_s17 = int_to_ptr.vmem [resolvable:$true] %s9_s17 }
   0x2   :  { %s262_s18 = scalar_lea.vmem %s10_s17, 16  ;;  %p267_p1 = scmp.lt.s32.totalorder %s10_s17, %s10_s17 }
   0x3   :  { %p263_p0 = scmp.ne.s32.totalorder %s10_s17, %s262_s18  ;;  %p268_p2 = scmp.lt.s32.totalorder %s262_s18, %s262_s18 }
   0x5   :  { %p269_p3 = por %p268_p2, %p267_p1 }
   0x7   :  { %p270_p4 = pnand %p269_p3, %p263_p0 }
   0x9   :  { %273 = shalt.err (!%p270_p4)  }
   0xa   :  { %s276_s19 = smov [#allocation3]  }
   0xb   :  { %12 = dma.vmem_to_smem %s10_s17, 16, %s276_s19, [#allocation2] }
   0xc   :  { %274 = dma.done.wait [#allocation2], 16 }
   0xd   :  { %275 = vsyncadd [#allocation2], 4294967280 }
   0xe   :  { %14 = sfence }
   0xf   :  { %v247_v0 = vld [vmem:[%s355_s1 + $0x38] sm:$0xff]   ;;  %v277_v1 = vmov 0   ;;  %v248_v2 = vld [vmem:[%s355_s1 + $0x30] sm:$0xff]   ;;  %v249_v3 = vld [vmem:[%s355_s1 + $0x28] sm:$0xff]   ;;  %vm135_vm0 = vcmask 588800   ;;  %vm139_vm1 = vcmask 1043456   ;;  %v186_v19 = vlaneseq }
  0x10   :  { %143 = vmatprep.subr.bf16.mxu0 %v277_v1  ;;  %246 = vset.pattern.permute.xlu0 %v277_v1  ;;  %v250_v4 = vld [vmem:[%s355_s1 + $0x20] sm:$0xff]   ;;  %v251_v8 = vld [vmem:[%s355_s1 + $0x18] sm:$0xff]   ;;  %v252_v9 = vld [vmem:[%s355_s1 + $0x10] sm:$0xff]   ;;  %s193_s21 = sld [smem:[#allocation3]] }
  0x11   :  { %144 = vmatpush1.bf16.msra.mxu0 %v247_v0  ;;  %v22_v5 = vld [vmem:[%s356_s2] sm:$0xff]  ;;  %v253_v10 = vld [vmem:[%s355_s1 + $0x8] sm:$0xff]   ;;  %v256_v14 = vld [vmem:[%s355_s1 + $0x58] sm:$0xff]   ;;  %v187_v20 = vand.u32 127, %v186_v19  ;;  %s239_s0 = sld [smem:[#allocation3 + $0x1]] }
  0x12   :  { %145 = vmatprep.subr.bf16.mxu0 %v277_v1  ;;  %v224_v6 = vcombine.high %v22_v5, %v22_v5  ;;  %v48_v7 = vld [vmem:[%s357_s3] sm:$0xff]  ;;  %v257_v15 = vld [vmem:[%s355_s1 + $0x50] sm:$0xff]   ;;  %v258_v16 = vld [vmem:[%s355_s1 + $0x48] sm:$0xff]   ;;  %v223_v18 = vcombine.low %v22_v5, %v22_v5 }
  0x13   :  { %51 = vperm.xlu0 %246, %v48_v7   ;;  %v254_v11 = vld [vmem:[%s355_s1] sm:$0xff]   ;;  %v240_v21 = vadd.s32 4294967232, %v187_v20  ;;  %vm202_vm2 = vcmp.ge.s32.totalorder %v187_v20, 64  ;;  %vm191_vm5 = vcmp.lt.s32.totalorder %v187_v20, 32  ;;  %vm196_vm6 = vcmp.ge.s32.totalorder %v187_v20, 32 }
  0x14   :  { %238 = vmatprep.mubr.msk.bf16.mxu0 %vm135_vm0, %v224_v6  ;;  %v255_v12 = vld [vmem:[%s355_s1 + $0x60] ss:$0 sps:$4 sm:$0xff]   ;;  %vm197_vm7 = vcmp.lt.s32.totalorder %v187_v20, 64 }
  0x15   :  { %146 = vmatpush1.bf16.msra.mxu0 %v248_v2  ;;  %v141_v13 = vsel %vm139_vm1, %v255_v12, 0  ;;  %v259_v17 = vld [vmem:[%s355_s1 + $0x40] sm:$0xff]   ;;  %v204_v22 = vsel %vm202_vm2, %v240_v21, %v187_v20  ;;  %vm198_vm8 = vmand %vm196_vm6, %vm197_vm7 }
  0x16   :  { %147 = vmatprep.subr.bf16.mxu0 %v277_v1  ;;  %v241_v23 = vadd.s32 4294967264, %v204_v22  ;;  %vm205_vm3 = vcmp.ge.s32.totalorder %v204_v22, 32  ;;  %v194_v27 = vstv %s193_s21 }
  0x17   :  { %v195_v30 = vsel %vm191_vm5, %v194_v27, 0  ;;  %v200_v31 = vstv %s239_s0 }
  0x18   :  { %v207_v24 = vsel %vm205_vm3, %v241_v23, %v204_v22  ;;  %v201_v34 = vsel %vm198_vm8, %v200_v31, %v195_v30 }
  0x19   :  { %148 = vmatpush1.bf16.msra.mxu0 %v249_v3  ;;  %v242_v25 = vadd.s32 4294967280, %v207_v24  ;;  %vm208_vm4 = vcmp.ge.s32.totalorder %v207_v24, 16 }
  0x1a   :  { %149 = vmatprep.subr.bf16.mxu0 %v277_v1 }
  0x1b   :  { %v210_v26 = vsel %vm208_vm4, %v242_v25, %v207_v24 }
  0x1c   :  { %v243_v28 = vadd.s32 4294967288, %v210_v26  ;;  %vm211_vm9 = vcmp.ge.s32.totalorder %v210_v26, 8 }
  0x1d   :  { %150 = vmatpush1.bf16.msra.mxu0 %v250_v4 }
  0x1e   :  { %151 = vmatprep.subr.bf16.mxu0 %v277_v1  ;;  %v213_v35 = vsel %vm211_vm9, %v243_v28, %v210_v26 }
  0x1f   :  { %vm214_vm10 = vcmp.lt.s32.totalorder %v213_v35, %v201_v34 }
  0x21   :  { %152 = vmatpush1.bf16.msra.mxu0 %v251_v8 }
  0x22   :  { %153 = vmatprep.subr.bf16.mxu0 %v277_v1 }
  0x25   :  { %154 = vmatpush1.bf16.msra.mxu0 %v252_v9 }
  0x26   :  { %155 = vmatprep.subr.bf16.mxu0 %v277_v1 }
  0x29   :  { %156 = vmatpush1.bf16.msra.mxu0 %v253_v10 }
  0x2a   :  { %157 = vmatprep.subr.bf16.mxu0 %v277_v1 }
  0x2d   :  { %158 = vmatpush1.bf16.msra.mxu0 %v254_v11 }
  0x2e   :  { %165 = vmatprep.subr.bf16.mxu0 %v277_v1 }
  0x31   :  { %166 = vmatpush2.bf16.msra.mxu0 %v141_v13 }
  0x32   :  { %167 = vmatprep.subr.bf16.mxu0 %v277_v1 }
  0x35   :  { %168 = vmatpush2.bf16.msra.mxu0 %v256_v14 }
  0x36   :  { %169 = vmatprep.subr.bf16.mxu0 %v277_v1 }
  0x39   :  { %170 = vmatpush2.bf16.msra.mxu0 %v257_v15 }
  0x3a   :  { %171 = vmatprep.subr.bf16.mxu0 %v277_v1 }
  0x3d   :  { %172 = vmatpush2.bf16.msra.mxu0 %v258_v16 }
  0x3e   :  { %173 = vmatprep.subr.bf16.mxu0 %v277_v1 }
  0x41   :  { %174 = vmatpush2.bf16.msra.mxu0 %v259_v17 }
  0x44   :  { %176 = vmatmul.mubr.bf16.vlgmr.msra.gmra.mxu0 %v223_v18 }
  0x8e   :  { %v52_v29 = vpop.permute.xlu0 %51 }
 0x104   :  { %v177_v32 = vpop.f32.mrf.mxu0 }
 0x105   :  { %v178_v33 = vadd.f32 %v177_v32, %v52_v29 }
 0x106   :  { %v179_v36 = vpop.f32.mrf.mxu0 }
 0x107   :  { %v183_v37 = vmax.f32 %v178_v33, 0.0 }
 0x108   :  { %v180_v38 = vpop.f32.mrf.mxu0 }
 0x109   :  { %v184_v39 = vmin.f32 %v183_v37, 20.0 }
 0x10a   :  { %v181_v40 = vpop.f32.mrf.mxu0 }
 0x10b   :  { %v217_v41 = vsel %vm214_vm10, %v184_v39, 0.0 }
 0x10c   :  { %218 = vst [vmem:[%s358_s4] sm:$0xff] %v217_v41 }

</bundles_post_ra>
